<compile_context>
chip_gen: v6e
topology: v6e:2x2x1
jax: 0.10.0
libtpu: 0.0.40
codegen_flags: <defaults>
</compile_context>

<pallas_src>
import functools

import jax
import jax.numpy as jnp
from jax import lax
from jax.experimental import pallas as pl
from jax.experimental.pallas import tpu as pltpu


_OUT_BLOCK_BYTES = 8 * 1024 * 1024      # budget for the double-buffered out block
_ONEHOT_TMP_BYTES = 4 * 1024 * 1024     # budget for per-step (jb, V) one-hot temporaries
_VMEM_FALLBACK_BYTES = 64 * 1024 * 1024  # conservative (v7x-sized) if query fails


def _vmem_capacity_bytes():
    try:
        return int(pltpu.get_tpu_info().vmem_capacity_bytes)
    except Exception:
        return _VMEM_FALLBACK_BYTES


def _budgets():
    """Generation-aware VMEM budgets (v5e/v6e: 128 MiB, v7x: 64 MiB)."""
    cap = _vmem_capacity_bytes()
    vmem_limit = max(min(int(cap * 0.82), cap - (8 << 20)), 32 << 20)
    # The whole-table BlockSpec may be double-buffered by the pipeline, so the
    # fast-path threshold budgets 2x the table plus the out blocks + margin.
    # TODO(synk): pin the constant-index table to a single buffer
    # (pipeline_mode=pl.Buffered(1)) once verified on the target jax/Mosaic;
    # that would double this threshold.
    table_thr = max(8 << 20, (vmem_limit - 2 * _OUT_BLOCK_BYTES - (4 << 20)) // 2)
    return vmem_limit, table_thr


def _onehot_vocab_cap():
    """Max vocab for the one-hot/MXU path (lower on v5e's smaller MXU)."""
    try:
        kind = jax.devices()[0].device_kind.lower()
    except Exception:
        kind = ""
    return 1024 if ("v5 lite" in kind or "v5e" in kind) else 2048


def _pick_chunks_per_step(nb, tp, s, max_rows, sublane):
    """Batch chunks handled per grid step.

    Constraints: nb % g == 0; the g*s sublane extent of the (tp, g*s, E)
    output block is tile-aligned for the table dtype (or g == nb, covering
    the full axis); total rows per step tp*g*s <= max_rows; and, when
    possible, the grid keeps >= 2 steps so the "parallel" axis can shard
    across v7x's two TensorCores (negligible cost on v5e/v6e).
    """
    legal = [g for g in range(1, nb + 1)
             if nb % g == 0 and ((g * s) % sublane == 0 or g == nb)]
    under = [g for g in legal if tp * g * s <= max_rows] or [min(legal)]
    multi = [g for g in under if nb // g >= 2]
    return max(multi) if multi else max(under)


def _make_onehot_kernel(tp, s, g, vocab):
    """Fast path: one-hot x table matmul on the MXU, dense (jb, E) stores."""
    jb = g * s

    def kernel(ids_ref, w_ref, o_ref):
        # ids_ref: VMEM (1, jb, tp) int32 -- this step's ids, final row order
        # w_ref:   VMEM (V, E) whole table (constant block index)
        # o_ref:   VMEM (tp, jb, E) output block, already at its final position
        ids = ids_ref[0]                                        # (jb, tp)
        table = w_ref[...]                                      # (V, E)
        viota = lax.broadcasted_iota(jnp.int32, (jb, vocab), 1)  # hoisted
        for r in range(tp):                                     # tp small, static
            onehot = jnp.where(ids[:, r:r + 1] == viota, 1.0, 0.0)
            onehot = onehot.astype(table.dtype)                 # (jb, V)
            rows = jnp.dot(onehot, table, preferred_element_type=jnp.float32)
            o_ref[r] = rows.astype(o_ref.dtype)                 # dense (jb, E) store

    return kernel


def _make_vmem_loop_kernel(tp, nb, s, g):
    """Large-vocab-in-VMEM fallback: per-row dynamic-slice gather."""
    jb = g * s
    nbs = nb * s

    def kernel(ids_ref, w_ref, o_ref):
        # TODO(synk): replace with a dense in-VMEM vector gather (jnp.take)
        # once Mosaic's dynamic-gather covers arbitrary-V row gathers; the
        # per-row dynamic slices below are the portable fallback.
        col0 = pl.program_id(0) * jb
        for r in range(tp):
            base = r * nbs + col0

            def body(t, carry, base=base, r=r):
                tok = ids_ref[base + t]
                o_ref[r, pl.ds(t, 1), :] = w_ref[pl.ds(tok, 1), :]
                return carry

            lax.fori_loop(0, jb, body, 0, unroll=min(jb, 8))

    return kernel


def _make_hbm_kernel(tp, nb, s, g):
    """Huge-vocab fallback: per-row HBM DMAs, one shared semaphore, all copies
    started before any wait so a deep window is in flight."""
    jb = g * s
    nbs = nb * s
    rows = tp * jb

    def kernel(ids_ref, w_hbm, o_ref, sem):
        col0 = pl.program_id(0) * jb
        # Phase 1: issue every row DMA (deep in-flight window, shared sem).
        for r in range(tp):
            base = r * nbs + col0

            def start(t, carry, base=base, r=r):
                tok = ids_ref[base + t]
                pltpu.make_async_copy(
                    w_hbm.at[pl.ds(tok, 1), :],
                    o_ref.at[r, pl.ds(t, 1), :],
                    sem.at[0],
                ).start()
                return carry

            lax.fori_loop(0, jb, start, 0, unroll=min(jb, 8))

        # Phase 2: one wait per issued copy on the shared semaphore. Every
        # copy moves an identical (1, E) row, so a fixed same-shaped
        # descriptor is valid for all waits (only sem + byte count matter).
        def wait(i, carry):
            pltpu.make_async_copy(
                w_hbm.at[pl.ds(0, 1), :],
                o_ref.at[0, pl.ds(0, 1), :],
                sem.at[0],
            ).wait()
            return carry

        lax.fori_loop(0, rows, wait, 0, unroll=min(rows, 8))

    return kernel


@functools.partial(jax.jit, static_argnums=(2, 3))
def row_parallel_embedding(x, weight, tp_size, force_path=None):
    """out[r] = concat_c( weight[x[c*tp + r]] .reshape(S*E) )  for r in [0, tp)."""
    b, s = x.shape
    v, e = weight.shape
    assert b % tp_size == 0, "batch must be divisible by tp_group.size()"
    nb = b // tp_size
    itemsize = jnp.dtype(weight.dtype).itemsize
    sublane = max(8, 32 // itemsize)          # dtype-aware sublane tile
    vmem_limit, table_thr = _budgets()
    table_bytes = v * e * itemsize

    if force_path is None:
        if (table_bytes <= table_thr and v <= _onehot_vocab_cap()
                and jnp.issubdtype(weight.dtype, jnp.floating)):
            path = "onehot"
        elif table_bytes <= table_thr:
            path = "vmem_loop"
        else:
            path = "hbm"
    else:
        path = force_path

    # Clamp ids: PyTorch Embedding would raise on OOB ids; clamping keeps all
    # VMEM reads / DMAs in bounds (tiny host-side tensor, negligible cost).
    ids = jnp.clip(x.astype(jnp.int32), 0, v - 1)

    # Rows per grid step bounded by the (double-buffered) output-block budget.
    max_rows = max(tp_size * s, _OUT_BLOCK_BYTES // (2 * e * itemsize))
    if path == "onehot":
        # Also bound the per-step (jb, V) one-hot / iota temporaries.
        max_rows = min(max_rows,
                       tp_size * max(s, _ONEHOT_TMP_BYTES // (12 * v)))
    g = _pick_chunks_per_step(nb, tp_size, s, max_rows, sublane)
    jb = g * s
    grid = (nb // g,)

    out_shape = jax.ShapeDtypeStruct((tp_size, nb * s, e), weight.dtype)
    cp = pltpu.CompilerParams(
        dimension_semantics=("parallel",),     # disjoint output blocks
        vmem_limit_bytes=vmem_limit,
    )

    if path == "onehot":
        # Per-step ids block in final row order:
        #   ids3[i, lc*s + t, r] = x[(i*g + lc)*tp + r, t]
        ids3 = (ids.reshape(nb // g, g, tp_size, s)
                   .transpose(0, 1, 3, 2)
                   .reshape(nb // g, jb, tp_size))
        out3 = pl.pallas_call(
            _make_onehot_kernel(tp_size, s, g, v),
            out_shape=out_shape,
            grid_spec=pltpu.PrefetchScalarGridSpec(
                num_scalar_prefetch=0,
                grid=grid,
                in_specs=[pl.BlockSpec((1, jb, tp_size), lambda i: (i, 0, 0)),
                          pl.BlockSpec((v, e), lambda i: (0, 0))],
                out_specs=pl.BlockSpec((tp_size, jb, e), lambda i: (0, i, 0)),
            ),
            compiler_params=cp,
        )(ids3, weight)
    else:
        # Scalar-prefetched ids in final row order for the gather/DMA paths:
        #   ids_perm[r*nb*s + c*s + t] = x[c*tp + r, t]
        # TODO(synk): for very large B*S, feed ids per grid step instead of
        # prefetching the whole array into SMEM.
        ids_perm = ids.reshape(nb, tp_size, s).transpose(1, 0, 2).reshape(-1)
        if path == "vmem_loop":
            kernel = _make_vmem_loop_kernel(tp_size, nb, s, g)
            in_specs = [pl.BlockSpec((v, e), lambda i, ids_r: (0, 0))]
            scratch = []
        else:  # "hbm"
            kernel = _make_hbm_kernel(tp_size, nb, s, g)
            in_specs = [pl.BlockSpec(memory_space=pl.ANY)]       # table in HBM
            scratch = [pltpu.SemaphoreType.DMA((1,))]            # shared sem
        out3 = pl.pallas_call(
            kernel,
            out_shape=out_shape,
            grid_spec=pltpu.PrefetchScalarGridSpec(
                num_scalar_prefetch=1,
                grid=grid,
                in_specs=in_specs,
                out_specs=pl.BlockSpec((tp_size, jb, e),
                                       lambda i, ids_r: (0, i, 0)),
                scratch_shapes=scratch,
            ),
            compiler_params=cp,
        )(ids_perm, weight)

    return out3.reshape(tp_size, nb * s * e)   # contiguous collapse: free


if __name__ == "__main__":
    vocab_size = 32
    embed_size = 128   # lane-aligned hidden
    batch = 4
    seq = 8
    tp_size = 2        # stand-in for tp_group.size()

    key = jax.random.PRNGKey(0)
    k_w, k_x = jax.random.split(key)
    weight = jax.random.normal(k_w, (vocab_size, embed_size), dtype=jnp.float32)
    x = jax.random.randint(k_x, (batch, seq), 0, vocab_size, dtype=jnp.int32)

    # Pure-JAX reference for the full forward.
    ref_emb = jnp.take(weight, x.reshape(-1), axis=0).reshape(batch, seq * embed_size)
    ref = jnp.concatenate(
        [ref_emb[c * tp_size:(c + 1) * tp_size] for c in range(batch // tp_size)],
        axis=1,
    )

    # Default path at this size: one-hot / MXU gather, table resident in VMEM.
    out = jax.block_until_ready(row_parallel_embedding(x, weight, tp_size))
    assert out.shape == (tp_size, (batch // tp_size) * seq * embed_size), out.shape
    assert out.dtype == weight.dtype
    assert jnp.allclose(out, ref), "one-hot/MXU path mismatch vs reference"

    # Exercise the two fallback paths as well so every code path stays verified.
    out_loop = jax.block_until_ready(
        row_parallel_embedding(x, weight, tp_size, "vmem_loop"))
    assert jnp.allclose(out_loop, ref), "VMEM row-gather path mismatch vs reference"

    out_hbm = jax.block_until_ready(
        row_parallel_embedding(x, weight, tp_size, "hbm"))
    assert jnp.allclose(out_hbm, ref), "HBM DMA path mismatch vs reference"

    print("KERNEL_OK")
</pallas_src>

<mosaic_0001>
module attributes {stable_mosaic.version = 11 : i64} {
  func.func @kernel(%arg0: i32, %arg1: memref<1x8x2xi32, #tpu.memory_space<vmem>>, %arg2: memref<32x128xf32, #tpu.memory_space<vmem>>, %arg3: memref<2x8x128xf32, #tpu.memory_space<vmem>>) attributes {dimension_semantics = [#tpu.dimension_semantics<parallel>], iteration_bounds = array<i64: 2>, scalar_prefetch = 0 : i64, scratch_operands = 0 : i64, tpu.core_type = #tpu.core_type<tc>, window_params = [{transform_indices = @transform_0, window_bounds = array<i64: 1, 8, 2>}, {pipeline_mode = #tpu.pipeline_mode<synchronous>, transform_indices = @transform_1, window_bounds = array<i64: 32, 128>}, {transform_indices = @transform_2, window_bounds = array<i64: 2, 8, 128>}]} {
    %c0 = arith.constant 0 : index
    %c0_0 = arith.constant 0 : index
    %c0_1 = arith.constant 0 : index
    %0 = vector.load %arg1[%c0, %c0_0, %c0_1] : memref<1x8x2xi32, #tpu.memory_space<vmem>>, vector<1x8x2xi32>
    %1 = vector.shape_cast %0 : vector<1x8x2xi32> to vector<8x2xi32>
    %c0_2 = arith.constant 0 : index
    %c0_3 = arith.constant 0 : index
    %2 = vector.load %arg2[%c0_2, %c0_3] : memref<32x128xf32, #tpu.memory_space<vmem>>, vector<32x128xf32>
    %3 = tpu.iota {dimensions = array<i32: 1>} : vector<8x32xi32>
    %4 = vector.extract_strided_slice %1 {offsets = [0, 0], sizes = [8, 1], strides = [1, 1]} : vector<8x2xi32> to vector<8x1xi32>
    %5 = vector.broadcast %4 : vector<8x1xi32> to vector<8x32xi32>
    %6 = arith.cmpi eq, %5, %3 : vector<8x32xi32>
    %cst = arith.constant 1.000000e+00 : f32
    %cst_4 = arith.constant 0.000000e+00 : f32
    %7 = vector.broadcast %cst : f32 to vector<8x32xf32>
    %8 = vector.broadcast %cst_4 : f32 to vector<8x32xf32>
    %9 = arith.select %6, %7, %8 : vector<8x32xi1>, vector<8x32xf32>
    %cst_5 = arith.constant dense<0.000000e+00> : vector<8x128xf32>
    %10 = tpu.matmul %9, %2, %cst_5 {dimension_numbers = #tpu.dot_dimension_numbers<[1], [0], [0], [1], [0, 0, 1, 1], [], []>} : vector<8x32xf32>, vector<32x128xf32>, vector<8x128xf32> -> vector<8x128xf32>
    %c0_6 = arith.constant 0 : index
    %c0_7 = arith.constant 0 : index
    %c0_8 = arith.constant 0 : index
    %11 = vector.load %arg3[%c0_6, %c0_7, %c0_8] : memref<2x8x128xf32, #tpu.memory_space<vmem>>, vector<1x8x128xf32>
    %12 = vector.shape_cast %11 : vector<1x8x128xf32> to vector<8x128xf32>
    %13 = vector.shape_cast %10 : vector<8x128xf32> to vector<1x8x128xf32>
    tpu.vector_store %arg3[%c0_6, %c0_7, %c0_8], %13 {strides = array<i32>} : memref<2x8x128xf32, #tpu.memory_space<vmem>>, vector<1x8x128xf32>,
    %14 = vector.extract_strided_slice %1 {offsets = [0, 1], sizes = [8, 1], strides = [1, 1]} : vector<8x2xi32> to vector<8x1xi32>
    %15 = vector.broadcast %14 : vector<8x1xi32> to vector<8x32xi32>
    %16 = arith.cmpi eq, %15, %3 : vector<8x32xi32>
    %cst_9 = arith.constant 1.000000e+00 : f32
    %cst_10 = arith.constant 0.000000e+00 : f32
    %17 = vector.broadcast %cst_9 : f32 to vector<8x32xf32>
    %18 = vector.broadcast %cst_10 : f32 to vector<8x32xf32>
    %19 = arith.select %16, %17, %18 : vector<8x32xi1>, vector<8x32xf32>
    %cst_11 = arith.constant dense<0.000000e+00> : vector<8x128xf32>
    %20 = tpu.matmul %19, %2, %cst_11 {dimension_numbers = #tpu.dot_dimension_numbers<[1], [0], [0], [1], [0, 0, 1, 1], [], []>} : vector<8x32xf32>, vector<32x128xf32>, vector<8x128xf32> -> vector<8x128xf32>
    %c1 = arith.constant 1 : index
    %c0_12 = arith.constant 0 : index
    %c0_13 = arith.constant 0 : index
    %21 = vector.load %arg3[%c1, %c0_12, %c0_13] : memref<2x8x128xf32, #tpu.memory_space<vmem>>, vector<1x8x128xf32>
    %22 = vector.shape_cast %21 : vector<1x8x128xf32> to vector<8x128xf32>
    %23 = vector.shape_cast %20 : vector<8x128xf32> to vector<1x8x128xf32>
    tpu.vector_store %arg3[%c1, %c0_12, %c0_13], %23 {strides = array<i32>} : memref<2x8x128xf32, #tpu.memory_space<vmem>>, vector<1x8x128xf32>,
    return
  }
  func.func @transform_0(%arg0: i32) -> (i32, i32, i32) {
    %c0_i32 = arith.constant 0 : i32
    %c0_i32_0 = arith.constant 0 : i32
    %c0_i32_1 = arith.constant 0 : i32
    return %arg0, %c0_i32, %c0_i32_0 : i32, i32, i32
  }
  func.func @transform_1(%arg0: i32) -> (i32, i32) {
    %c0_i32 = arith.constant 0 : i32
    %c0_i32_0 = arith.constant 0 : i32
    %c0_i32_1 = arith.constant 0 : i32
    return %c0_i32, %c0_i32_0 : i32, i32
  }
  func.func @transform_2(%arg0: i32) -> (i32, i32, i32) {
    %c0_i32 = arith.constant 0 : i32
    %c0_i32_0 = arith.constant 0 : i32
    %c0_i32_1 = arith.constant 0 : i32
    return %c0_i32, %arg0, %c0_i32_0 : i32, i32, i32
  }
}

</mosaic_0001>

<bundles_post_ra>
// kernel: row_parallel_embedding.1
= control target key start
LH: loop header
LB: loop body
LE: loop exit
PB: predicated region body
PF: predicated region fallthrough
CT: control target
= control target key end

     0   :  { %7 = vsyncpa [#allocation3], 0  ;;  %s592_s9 = smov 0   ;;  %s594_s10 = smov 0   ;;  %s661_s0 = inlined_call_operand.vmem [shape: s32[2,8,2], index: 0, kind: input, shape index: {}]   ;;  %s662_s1 = inlined_call_operand.hbm [shape: f32[32,128], index: 1, kind: input, shape index: {}]   ;;  %s663_s2 = inlined_call_operand.vmem [shape: f32[2,16,128], index: 2, kind: output, shape index: {}]  }
   0x1   :  { %s596_s11 = smov 0  }
   0x2 LB: > { %s605_s12 = sadd.s32 4294967295, %s568_s11   ;;  %s607_s13 = sadd.s32 1, %s568_s11   ;;  %s568_s11 = sphi %s596_s11, %s668_s11   ;;  %s564_s10 = sphi %s594_s10, %s667_s10   ;;  %s560_s9 = sphi %s592_s9, %s666_s9  }
   0x3   : > { %s64_s14 = ssub.s32 %s568_s11, %s607_s13  ;;  %s67_s15 = sadd.s32 1, %s564_s10 }
   0x4   : > { %p65_p0 = scmp.eq.s32.totalorder %s64_s14, 0  ;;  %p77_p1 = scmp.ne.s32.totalorder %s564_s10, %s560_s9 }
   0x5   : > { %p78_p2 = scmp.eq.s32.totalorder %s605_s12, 1  ;;  %p427_p3 = scmp.ge.s32.totalorder %s568_s11, 1 }
   0x6   : > { %s615_s16 = scalar_select %p65_p0, %s564_s10, %s67_s15  }
   0x7   : > { %p617_p4 = por %p78_p2, %p77_p1  ;;  %p91_p5 = scmp.lt.s32.totalorder %s568_s11, 3 }
   0x8   : > { %p481_p6 = scmp.eq.s32.totalorder %s605_s12, 0  ;;  %s570_s19 = smov [#allocation2]  }
   0x9   : > { %p622_p7 = pnand %p427_p3, %p91_p5  ;;  %s103_s20 = sshll.u32 %s570_s19, 4  ;;  %s104_s20 = int_to_ptr.vmem [resolvable:$true] %s103_s20 }
   0xa   : > { %s527_s21 = scalar_lea.vmem %s104_s20, 512  ;;  %p535_p0 = scmp.lt.s32.totalorder %s104_s20, %s104_s20 }
   0xb   : > { %p477_p8 = pneg %p622_p7  ;;  %p528_p11 = scmp.ne.s32.totalorder %s104_s20, %s527_s21 }
   0xc   : > { %p536_p1 = scmp.lt.s32.totalorder %s527_s21, %s527_s21 }
   0xd   : > { %p478_p9 = pnand %p481_p6, %p477_p8 }
   0xe   : > { %p537_p2 = por %p536_p1, %p535_p0 }
   0xf   : > { %p518_p10 = pneg %p478_p9 }
  0x11   : > { %p530_p12 = pnand %p528_p11, %p518_p10 }
  0x13   : > { %p531_p13 = pneg %p530_p12 }
  0x15   : > { %p538_p3 = pnand %p537_p2, %p531_p13 }
  0x17   : > { %541 = shalt.err (!%p538_p3)
}
  0x18   : > { %s571_s22 = smov 128   ;;  %s572_s23 = smov 8  }
  0x19   : > { %480 = dma.hbm_to_vmem [thread:$0]  (!%p478_p9), %s662_s1, 512, %s104_s20, [#allocation3], %s571_s22, %s571_s22, %s572_s23  }
  0x1a   : > { %126 = sbr.rel (%p622_p7) target bundleno = 372 (0x174), region = 28 }
  0x1f   : > { %555 = dma.done.wait (%p481_p6), [#allocation3], 512  }
  0x20   : > { %557 = vsyncadd (%p481_p6), [#allocation3], 4294966784  ;;  %p146_p5 = scmp.lt.s32.totalorder %s605_s12, 1  ;;  %v573_v0 = vmov 0   ;;  %v574_v1 = vmov 0.0   ;;  %vm575_vm0 = vmmov 0   ;;  %v155_v8 = vlaneseq }
  0x21   : > { %514 = vset.pattern.permute.xlu0 %v573_v0  ;;  %451 = vmatprep.subr.mxu0 %v574_v1  ;;  %v154_v3 = vld [vmem:[#allocation2 + $0x18] sm:$0xff]  ;;  %v153_v4 = vld [vmem:[#allocation2 + $0x10] sm:$0xff]  ;;  %v152_v5 = vld [vmem:[#allocation2 + $0x8] sm:$0xff]  ;;  %v576_v7 = vmov 1   ;;  %vm162_vm1 = vcmask 261120   ;;  %s143_s3 = sand.u32 1, %s560_s9  }
  0x22   : > { %s147_s26 = scalar_select %p146_p5, %s605_s12, 1  ;;  %462 = vmatprep.subr.mxu1 %v574_v1  ;;  %459 = vmatprep.mubr.msk.f32.mxu0 %vm575_vm0, %v574_v1  ;;  %v151_v6 = vld [vmem:[#allocation2] sm:$0xff]  ;;  %v156_v9 = vand.u32 127, %v155_v8 }
  0x23   : > { %470 = vmatprep.mubr.msk.f32.mxu1 %vm575_vm0, %v574_v1  ;;  %452 = vmatpush3.msra.mxu0 %v154_v3  ;;  %s432_s4 = sshll.u32 %s143_s3, 4  ;;  %s438_s6 = sshll.u32 (%p617_p4), %s605_s12, 3 }
  0x24   : > { %s433_s27 = sshll.u32 %s147_s26, 3  ;;  %453 = vmatprep.subr.mxu0 %v574_v1  ;;  %463 = vmatpush3.msra.mxu1 %v154_v3  ;;  %s145_s5 = scalar_lea.vmem [#allocation4], %s432_s4 }
  0x25   : > { %s149_s30 = scalar_lea.vmem %s661_s0, %s433_s27  ;;  %454 = vmatpush3.msra.mxu0 %v153_v4  ;;  %464 = vmatprep.subr.mxu1 %v574_v1  ;;  %s325_s11 = scalar_lea.vmem (%p617_p4), %s663_s2, %s438_s6 }
  0x26   : > { %v150_v2 = vld [vmem:[%s149_s30] sm:$0xff]  ;;  %455 = vmatprep.subr.mxu0 %v574_v1  ;;  %465 = vmatpush3.msra.mxu1 %v153_v4 }
  0x27   : > { %158 = vperm.xlu0 %514, %v150_v2   ;;  %456 = vmatpush3.msra.mxu0 %v152_v5 }
  0x28   : > { %457 = vmatprep.subr.mxu0 %v574_v1  ;;  %466 = vmatprep.subr.mxu1 %v574_v1 }
  0x29   : > { %458 = vmatpush3.msra.mxu0 %v151_v6  ;;  %467 = vmatpush3.msra.mxu1 %v152_v5 }
  0x2a   : > { %468 = vmatprep.subr.mxu1 %v574_v1 }
  0x2b   : > { %515 = vset.pattern.permute.xlu0 %v576_v7  ;;  %469 = vmatpush3.msra.mxu1 %v151_v6 }
  0x2c   : > { %238 = vperm.xlu0 %515, %v150_v2  }
  0xa2   : > { %v159_v10 = vpop.permute.xlu0 %158 }
  0xa3   : > { %vm160_vm2 = vcmp.eq.s32.totalorder %v159_v10, %v156_v9 }
  0xa4   : > { %v161_v11 = vsel %vm160_vm2, 1.0, %v574_v1 }
  0xa5   : > { %460 = vmatmul.mubr.msk.f32.vlgmr.msra.gmra.mxu0 %vm162_vm1, %v161_v11 }
  0xa7   : > { %v239_v12 = vpop.permute.xlu0 %238 }
  0xa8   : > { %vm240_vm3 = vcmp.eq.s32.totalorder %v239_v12, %v156_v9 }
  0xa9   : > { %v241_v13 = vsel %vm240_vm3, 1.0, %v574_v1 }
  0xaa   : > { %471 = vmatmul.mubr.msk.f32.vlgmr.msra.gmra.mxu1 %vm162_vm1, %v241_v13 }
 0x165   : > { %v232_v14 = vpop.f32.mrf.mxu0 }
 0x166   : > { %236 = vst [vmem:[%s145_s5] sm:$0xff] %v232_v14 }
 0x167   : > { %v461_v15 = vpop.f32.mrf.mxu0 }
 0x168   : > { %323 = sbr.rel (!%p617_p4) target bundleno = 372 (0x174), region = 36 }
 0x16a   : > { %v311_v16 = vpop.f32.mrf.mxu1 }
 0x16b   : > { %436 = vst [vmem:[%s145_s5 + $0x8] sm:$0xff] %v311_v16 }
 0x16c   : > { %v472_v17 = vpop.f32.mrf.mxu1 }
 0x16d   : > { %v356_v18 = vld [vmem:[%s145_s5] sm:$0xff] }
 0x16e   : > { %357 = vst [vmem:[%s325_s11] sm:$0xff] %v356_v18 }
 0x172   : > { %v358_v19 = vld [vmem:[%s145_s5 + $0x8] sm:$0xff] }
 0x173   : > { %359 = vst [vmem:[%s325_s11 + $0x10] sm:$0xff] %v358_v19 }
 0x174 PF: > { %p10_p6 = scmp.ge.s32.totalorder %s607_s13, 4   ;;  %s666_s9 = smov %s564_s10 }
 0x175   : > { %s667_s10 = smov %s615_s16  ;;  %s668_s11 = smov %s607_s13 }
 0x176   :  { %12 = sbr.rel (!%p10_p6) target bundleno = 2 (0x2), region = 102 }
 0x17b   :  { %375 = vsyncpa [#allocation3], 1 }
 0x17c   :  { %377 = vsyncpa [#allocation3 + $0x1], 1 }

</bundles_post_ra>
